<compile_context>
chip_gen: v7x
topology: tpu7x:2x2x1
jax: 0.10.0
libtpu: 0.0.40
codegen_flags: <defaults>
</compile_context>

<pallas_src>
import functools

import jax
import jax.numpy as jnp
from jax.experimental import pallas as pl
from jax.experimental.pallas import tpu as pltpu


def _rmsnorm_kernel(x_ref, w_ref, o_ref, *, eps):
    # x_ref: (tile_rows, dim) block in VMEM
    # w_ref: (1, dim) weight in the promoted output dtype (fetched once;
    #        block index is fixed across the grid)
    x = x_ref[...].astype(jnp.float32)
    ms = jnp.mean(x * x, axis=-1, keepdims=True)          # XLU cross-lane reduce
    inv = jax.lax.rsqrt(ms + eps)                         # EUP rsqrt
    normed = (x * inv).astype(x_ref.dtype)                # .type_as(x)
    # weight is already out_dtype -> single promotion at most, store is lane-dense
    o_ref[...] = (normed * w_ref[...]).astype(o_ref.dtype)


def _pick_tile_rows(rows, dim, x_dtype, out_dtype):
    """Largest sublane-aligned row tile with a modest (~12 MiB) VMEM footprint."""
    x_bytes = jnp.dtype(x_dtype).itemsize
    out_bytes = jnp.dtype(out_dtype).itemsize
    sublane = max(8, 32 // x_bytes)           # 8 f32, 16 bf16, 32 int8
    # Per-row VMEM bytes:
    #   2x double-buffered input (native dtype)
    #   2x double-buffered output (PROMOTED dtype)
    #   ~3 f32 temporaries from the in-kernel upcast (x, x*x, x*inv)
    per_row = 2 * dim * x_bytes + 2 * dim * out_bytes + 3 * dim * 4
    budget = 12 * 1024 * 1024                 # ~8-16 MiB blocks already hit roofline
    tr = budget // max(per_row, 1)
    tr = min(tr, 512)                         # no measurable gain past ~512 rows
    tr = max((tr // sublane) * sublane, sublane)

    rows_rounded = -(-rows // sublane) * sublane
    # Keep the grid >= 4 blocks when there are enough rows, so ("parallel",)
    # can shard across v7x's 2 TensorCores (harmless on v5e/v6e).
    min_blocks = 4
    if rows_rounded >= min_blocks * sublane:
        max_tr = max((rows_rounded // min_blocks) // sublane * sublane, sublane)
        tr = min(tr, max_tr)
    return int(min(tr, rows_rounded))


def _pick_vmem_limit():
    """~0.75x physical VMEM per TensorCore, capped at 64 MiB (v5e/v6e)."""
    try:
        cap = pltpu.get_tpu_info().vmem_capacity_bytes
    except Exception:
        cap = 128 * 1024 * 1024
    return int(min(cap * 3 // 4, 64 * 1024 * 1024))


def rmsnorm(x, weight, eps=1e-6, tile_rows=None):
    """RMSNorm over the last axis of x. weight has shape (x.shape[-1],)."""
    orig_shape = x.shape
    dim = orig_shape[-1]
    x2d = x.reshape(-1, dim)
    rows = x2d.shape[0]

    out_dtype = jnp.promote_types(x.dtype, weight.dtype)
    # One-time cast in the wrapper: no per-block dtype promotion in the kernel.
    w2d = weight.astype(out_dtype).reshape(1, dim)

    if tile_rows is None:
        tile_rows = _pick_tile_rows(rows, dim, x2d.dtype, out_dtype)

    # TODO(synk): for dim % 128 != 0, fold multiple rows into the lane axis
    # (segmented reduce) to avoid lane-masked vst.msk stores; as written the
    # kernel is lane-dense only when dim is a multiple of 128.

    grid = (pl.cdiv(rows, tile_rows),)        # ragged last block handled by Pallas
    out = pl.pallas_call(
        functools.partial(_rmsnorm_kernel, eps=float(eps)),
        out_shape=jax.ShapeDtypeStruct((rows, dim), out_dtype),
        grid_spec=pltpu.PrefetchScalarGridSpec(
            num_scalar_prefetch=0,
            grid=grid,
            in_specs=[
                pl.BlockSpec((tile_rows, dim), lambda i: (i, 0)),
                pl.BlockSpec((1, dim), lambda i: (0, 0)),
            ],
            out_specs=pl.BlockSpec((tile_rows, dim), lambda i: (i, 0)),
        ),
        compiler_params=pltpu.CompilerParams(
            dimension_semantics=("parallel",),
            vmem_limit_bytes=_pick_vmem_limit(),
        ),
    )(x2d, w2d)

    return out.reshape(orig_shape[:-1] + (dim,))


if __name__ == "__main__":
    key = jax.random.PRNGKey(0)
    batch, seq, hidden = 2, 8, 32

    x = jax.random.normal(key, (batch, seq, hidden), dtype=jnp.float32)
    # Deterministic parameter init matching nn.Parameter(torch.ones(dim)).
    weight = jnp.ones((hidden,), dtype=jnp.float32)
    eps = 1e-6

    y = rmsnorm(x, weight, eps)
    y = jax.block_until_ready(y)

    # Reference check in plain JAX.
    xf = x.astype(jnp.float32)
    ref = (xf * jax.lax.rsqrt(jnp.mean(xf * xf, axis=-1, keepdims=True) + eps)
           ).astype(x.dtype) * weight
    assert y.shape == ref.shape, "shape mismatch vs reference"
    assert jnp.allclose(y, ref, atol=1e-5, rtol=1e-5), "mismatch vs reference"

    print("KERNEL_OK")
</pallas_src>

<mosaic_0001>
module attributes {stable_mosaic.version = 11 : i64} {
  func.func @_rmsnorm_kernel(%arg0: i32, %arg1: memref<16x32xf32, #tpu.memory_space<vmem>>, %arg2: memref<1x32xf32, #tpu.memory_space<vmem>>, %arg3: memref<16x32xf32, #tpu.memory_space<vmem>>) attributes {dimension_semantics = [#tpu.dimension_semantics<parallel>], iteration_bounds = array<i64: 1>, scalar_prefetch = 0 : i64, scratch_operands = 0 : i64, tpu.core_type = #tpu.core_type<tc>, window_params = [{transform_indices = @transform_0, window_bounds = array<i64: 16, 32>}, {pipeline_mode = #tpu.pipeline_mode<synchronous>, transform_indices = @transform_1, window_bounds = array<i64: 1, 32>}, {transform_indices = @transform_2, window_bounds = array<i64: 16, 32>}]} {
    %c0 = arith.constant 0 : index
    %c0_0 = arith.constant 0 : index
    %0 = vector.load %arg1[%c0, %c0_0] : memref<16x32xf32, #tpu.memory_space<vmem>>, vector<16x32xf32>
    %1 = arith.mulf %0, %0 : vector<16x32xf32>
    %cst = arith.constant dense<0.000000e+00> : vector<16xf32>
    %2 = vector.multi_reduction <add>, %1, %cst [1] : vector<16x32xf32> to vector<16xf32>
    %3 = vector.shape_cast %2 : vector<16xf32> to vector<16x1xf32>
    %cst_1 = arith.constant 3.200000e+01 : f32
    %4 = vector.broadcast %cst_1 : f32 to vector<16x1xf32>
    %5 = arith.divf %3, %4 : vector<16x1xf32>
    %cst_2 = arith.constant 9.99999997E-7 : f32
    %6 = vector.broadcast %cst_2 : f32 to vector<16x1xf32>
    %7 = arith.addf %5, %6 : vector<16x1xf32>
    %8 = math.rsqrt %7 : vector<16x1xf32>
    %9 = vector.broadcast %8 : vector<16x1xf32> to vector<16x32xf32>
    %10 = arith.mulf %0, %9 : vector<16x32xf32>
    %c0_3 = arith.constant 0 : index
    %c0_4 = arith.constant 0 : index
    %11 = vector.load %arg2[%c0_3, %c0_4] : memref<1x32xf32, #tpu.memory_space<vmem>>, vector<1x32xf32>
    %12 = vector.broadcast %11 : vector<1x32xf32> to vector<16x32xf32>
    %13 = arith.mulf %10, %12 : vector<16x32xf32>
    %c0_5 = arith.constant 0 : index
    %c0_6 = arith.constant 0 : index
    %14 = vector.load %arg3[%c0_5, %c0_6] : memref<16x32xf32, #tpu.memory_space<vmem>>, vector<16x32xf32>
    tpu.vector_store %arg3[%c0_5, %c0_6], %13 {strides = array<i32>} : memref<16x32xf32, #tpu.memory_space<vmem>>, vector<16x32xf32>,
    return
  }
  func.func @transform_0(%arg0: i32) -> (i32, i32) {
    %c0_i32 = arith.constant 0 : i32
    %c0_i32_0 = arith.constant 0 : i32
    return %arg0, %c0_i32 : i32, i32
  }
  func.func @transform_1(%arg0: i32) -> (i32, i32) {
    %c0_i32 = arith.constant 0 : i32
    %c0_i32_0 = arith.constant 0 : i32
    %c0_i32_1 = arith.constant 0 : i32
    return %c0_i32, %c0_i32_0 : i32, i32
  }
  func.func @transform_2(%arg0: i32) -> (i32, i32) {
    %c0_i32 = arith.constant 0 : i32
    %c0_i32_0 = arith.constant 0 : i32
    return %arg0, %c0_i32 : i32, i32
  }
}

</mosaic_0001>

<bundles_post_ra>
// kernel: tpu_custom_call.1
= control target key start
LH: loop header
LB: loop body
LE: loop exit
PB: predicated region body
PF: predicated region fallthrough
CT: control target
= control target key end

     0   :  { %7 = vsyncpa [#allocation3], 0  ;;  %s235_s0 = inlined_call_operand.hbm [shape: f32[16,32], index: 0, kind: input, shape index: {}]   ;;  %s236_s1 = inlined_call_operand.hbm [shape: f32[1,32], index: 1, kind: input, shape index: {}]   ;;  %s237_s2 = inlined_call_operand.hbm [shape: f32[16,32], index: 2, kind: output, shape index: {}]  }
   0x1   :  { %8 = vsyncpa [#allocation6], 0 }
   0x2   :  { %9 = vsyncpa [#allocation4], 0  ;;  %s169_s9 = smov [#allocation2]   ;;  %s97_s13 = scalar_lea.hbm %s235_s0, 256 }
   0x3   :  { %s15_s10 = sshll.u32 %s169_s9, 4  ;;  %p98_p0 = scmp.ne.s32.totalorder %s235_s0, %s97_s13  ;;  %s16_s10 = int_to_ptr.vmem [resolvable:$true] %s15_s10 }
   0x4   :  { %p101_p1 = scmp.lt.u32.totalorder %s97_s13, %s235_s0 }
   0x6   :  { %p103_p2 = pnand %p101_p1, %p98_p0 }
   0x8   :  { %106 = shalt.err (!%p103_p2)
}
   0x9   :  { %s107_s18 = scalar_lea.vmem %s16_s10, 256  ;;  %p112_p4 = scmp.lt.s32.totalorder %s16_s10, %s16_s10 }
   0xa   :  { %p108_p3 = scmp.ne.s32.totalorder %s16_s10, %s107_s18  ;;  %p113_p5 = scmp.lt.s32.totalorder %s107_s18, %s107_s18 }
   0xc   :  { %p114_p6 = por %p113_p5, %p112_p4 }
   0xe   :  { %p115_p7 = pnand %p114_p6, %p108_p3 }
  0x10   :  { %118 = shalt.err (!%p115_p7)
}
  0x11   :  { %s170_s19 = smov 128   ;;  %s171_s20 = smov 8  }
  0x12   :  { %21 = dma.hbm_to_vmem [thread:$0]  %s235_s0, 256, %s16_s10, [#allocation3], %s170_s19, %s170_s19, %s171_s20  }
  0x13   :  { %s172_s23 = smov [#allocation5]   ;;  %s119_s27 = scalar_lea.hbm %s236_s1, 16 }
  0x14   :  { %s28_s24 = sshll.u32 %s172_s23, 4  ;;  %p120_p8 = scmp.ne.s32.totalorder %s236_s1, %s119_s27  ;;  %s29_s24 = int_to_ptr.vmem [resolvable:$true] %s28_s24 }
  0x15   :  { %p123_p9 = scmp.lt.u32.totalorder %s119_s27, %s236_s1 }
  0x17   :  { %p125_p10 = pnand %p123_p9, %p120_p8 }
  0x19   :  { %128 = shalt.err (!%p125_p10)
}
  0x1a   :  { %s129_s4 = scalar_lea.vmem %s29_s24, 16  ;;  %s133_s0 = scalar_lea.vmem %s29_s24, 32 }
  0x1b   :  { %p130_p11 = scmp.ne.s32.totalorder %s29_s24, %s129_s4  ;;  %p134_p12 = scmp.lt.s32.totalorder %s29_s24, %s29_s24 }
  0x1c   :  { %p135_p13 = scmp.lt.s32.totalorder %s133_s0, %s129_s4 }
  0x1e   :  { %p136_p0 = por %p135_p13, %p134_p12 }
  0x20   :  { %p137_p1 = pnand %p136_p0, %p130_p11 }
  0x22   :  { %140 = shalt.err (!%p137_p1)
}
  0x23   :  { %31 = dma.hbm_to_vmem [thread:$0]  %s236_s1, 16, %s29_s24, [#allocation6]  }
  0x24   :  { %163 = dma.done.wait [#allocation3], 256  }
  0x25   :  { %164 = vsyncadd [#allocation3], 4294967040 }
  0x26   :  { %165 = dma.done.wait [#allocation6], 16  }
  0x27   :  { %166 = vsyncadd [#allocation6], 4294967280  ;;  %v38_v0 = vld [vmem:[#allocation2] sm:$0xff]  ;;  %vm42_vm0 = vcmask 261120   ;;  %v39_v1 = vld [vmem:[#allocation2 + $0x8] sm:$0xff]  ;;  %s173_s1 = smov [#allocation7]  }
  0x28   :  { %v40_v2 = vmul.f32 %v38_v0, %v38_v0  ;;  %v41_v3 = vmul.f32 %v39_v1, %v39_v1  ;;  %v87_v13 = vld [vmem:[#allocation5] ss:$0 sm:$0xff]  ;;  %s74_s7 = sshll.u32 %s173_s1, 4  ;;  %s75_s7 = int_to_ptr.vmem [resolvable:$true] %s74_s7 }
  0x29   :  { %s141_s8 = scalar_lea.vmem %s75_s7, 256  ;;  %p146_p3 = scmp.lt.s32.totalorder %s75_s7, %s75_s7 }
  0x2a   :  { %v43_v4 = vsel %vm42_vm0, %v40_v2, 0.0  ;;  %v46_v5 = vsel %vm42_vm0, %v41_v3, 0.0  ;;  %p142_p2 = scmp.ne.s32.totalorder %s75_s7, %s141_s8  ;;  %p147_p4 = scmp.lt.s32.totalorder %s141_s8, %s141_s8 }
  0x2b   :  { %44 = vadd.xlane.f32.xlu0 %v43_v4 }
  0x2c   :  { %p148_p5 = por %p147_p4, %p146_p3 }
  0x2e   :  { %p149_p6 = pnand %p148_p5, %p142_p2 }
  0x2f   :  { %47 = vadd.xlane.f32.xlu0 %v46_v5 }
  0xb8   :  { %v45_v6 = vpop.xlane.xlu0 %44 }
  0xb9   :  { %v50_v7 = vmul.f32 0.03125, %v45_v6 }
  0xbb   :  { %v52_v8 = vadd.f32 1e-06, %v50_v7 }
  0xbc   :  { %v48_v9 = vpop.xlane.xlu0 %47 }
  0xbd   :  { %93 = vrsqrt.f32 %v52_v8  ;;  %v51_v10 = vmul.f32 0.03125, %v48_v9 }
  0xbf   :  { %v53_v11 = vadd.f32 1e-06, %v51_v10 }
  0xc1   :  { %95 = vrsqrt.f32 %v53_v11 }
  0xc7   :  { %v94_v12 = vpop.eup %93 }
  0xc8   :  { %v56_v14 = vmul.f32 %v94_v12, %v38_v0 }
  0xca   :  { %v65_v15 = vmul.f32 %v87_v13, %v56_v14 }
  0xcb   :  { %v96_v16 = vpop.eup %95 }
  0xcc   :  { %v57_v17 = vmul.f32 %v96_v16, %v39_v1  ;;  %67 = vst.msk [vmem:[#allocation7] sm:$0xff] %vm42_vm0, %v65_v15 }
  0xce   :  { %v66_v18 = vmul.f32 %v87_v13, %v57_v17 }
  0xd0   :  { %68 = vst.msk [vmem:[#allocation7 + $0x8] sm:$0xff] %vm42_vm0, %v66_v18 }
  0xd1   :  { %152 = shalt.err (!%p149_p6)
}
  0xd2   :  { %s153_s11 = scalar_lea.hbm %s237_s2, 256 }
  0xd3   :  { %p154_p7 = scmp.ne.s32.totalorder %s237_s2, %s153_s11  ;;  %p157_p8 = scmp.lt.u32.totalorder %s153_s11, %s237_s2 }
  0xd5   :  { %p159_p9 = pnand %p157_p8, %p154_p7 }
  0xd7   :  { %162 = shalt.err (!%p159_p9)
}
  0xd8   :  { %80 = dma.vmem_to_hbm [thread:$0]  %s75_s7, 256, %s237_s2, [#allocation4], %s170_s19, %s170_s19, %s171_s20  }
  0xd9   :  { %167 = dma.done.wait [#allocation4], 256  }
  0xda   :  { %168 = vsyncadd [#allocation4], 4294967040 }
  0xdb   :  { %84 = vsyncpa [#allocation3], 1 }
  0xdc   :  { %85 = vsyncpa [#allocation6], 1 }
  0xdd   :  { %86 = vsyncpa [#allocation4], 1 }

</bundles_post_ra>
